<compile_context>
chip_gen: v5e
topology: v5e:2x2
jax: 0.10.0
libtpu: 0.0.40
codegen_flags: <defaults>
</compile_context>

<pallas_src>
import functools

import jax
import jax.numpy as jnp
from jax import lax
from jax.experimental import pallas as pl
from jax.experimental.pallas import tpu as pltpu

TEMPERATURE = 0.07
BASE_TEMPERATURE = 0.07

# Tile targets (multiples of 8 sublanes / 128 lanes).  Shrunk per-call to fit
# the generation-dependent VMEM budget below.
_TILE_B = 256
_TILE_N = 1024


def _round_up(x, m):
    return ((x + m - 1) // m) * m


def _pad_2d(x, rows, cols):
    if rows == x.shape[0] and cols == x.shape[1]:
        return x
    return jnp.pad(x, ((0, rows - x.shape[0]), (0, cols - x.shape[1])))


def _vmem_budget_bytes():
    """3/4 of physical VMEM, capped at 96 MiB (v5e/v6e: 128 MiB, v7x: 64 MiB)."""
    cap = 64 * 1024 * 1024  # conservative fallback (v7x per-TC)
    try:
        info = pltpu.get_tpu_info()
        cap = int(getattr(info, "vmem_capacity_bytes", cap)) or cap
    except Exception:
        pass
    return min(96 * 1024 * 1024, (cap * 3) // 4)


# ----------------------------------------------------------------------------
# Branch 1: mask is not None  (supervised-contrastive term)
# ----------------------------------------------------------------------------
def _supcon_masked_kernel(q_ref, feat_ref, mask_ref, cnt_ref, out_ref,
                          q_sc, m_sc, s_sc, num_sc, *,
                          inv_t, neg_t_over_bt, n_valid, tile_b, tile_n):
    """One (B-tile, N-tile) step of the online-softmax SupCon loss."""
    jn = pl.program_id(1)

    @pl.when(jn == 0)
    def _init():
        # 1/T folded into the anchors ONCE per B-tile (hoisted out of the N
        # loop); stored back in the feature dtype so bf16 keeps the bf16 MXU.
        q = q_ref[...]
        q_sc[...] = (q.astype(jnp.float32) * inv_t).astype(q_sc.dtype)
        m_sc[...] = jnp.full_like(m_sc, -jnp.inf)
        s_sc[...] = jnp.zeros_like(s_sc)
        num_sc[...] = jnp.zeros_like(num_sc)

    # anchor_dot_contrast / T  -> contract over D on the MXU, f32 accumulate.
    adc = lax.dot_general(q_sc[...], feat_ref[...], (((1,), (1,)), ((), ())),
                          preferred_element_type=jnp.float32)        # [TB, TN]

    # Global row / column ids of this tile.
    row = pl.program_id(0) * tile_b + lax.broadcasted_iota(jnp.int32, adc.shape, 0)
    col = jn * tile_n + lax.broadcasted_iota(jnp.int32, adc.shape, 1)
    not_diag = row != col                   # torch.scatter(ones, 1, arange(B), 0)
    lmask = jnp.logical_and(col < n_valid, not_diag)

    # Fused single mask for both the running max and the exp-sum.
    adc_m = jnp.where(lmask, adc, -jnp.inf)                           # [TB, TN]
    m_prev = m_sc[...]
    m_new = jnp.maximum(m_prev, jnp.max(adc_m, axis=1, keepdims=True))
    p = jnp.exp(adc_m - m_new)              # exp(-inf) == 0 handles masked cols
    s_sc[...] = jnp.exp(m_prev - m_new) * s_sc[...] + jnp.sum(p, axis=1, keepdims=True)

    # sum(mask * log_prob) == sum(mask*adc) - cnt*(m + log(denom)); accumulate
    # only the numerator piece (cnt is precomputed in the wrapper).  Padded
    # mask columns are already zero.
    mask_eff = jnp.where(not_diag, mask_ref[...].astype(jnp.float32), 0.0)
    num_sc[...] += jnp.sum(mask_eff * adc, axis=1, keepdims=True)
    m_sc[...] = m_new

    @pl.when(jn == pl.num_programs(1) - 1)
    def _finalize():
        cnt = cnt_ref[...]                                            # [TB, 1]
        log_denom = jnp.log(s_sc[...] + 1e-12)       # matches torch's + 1e-12
        # Exact divide: once per B-tile on a [TB, 1] vector, off the streaming
        # path.  Rows with cnt == 0 give NaN, matching the PyTorch reference;
        # padded rows are fed cnt == 1 by the wrapper so they stay finite.
        mean_log_prob_pos = (num_sc[...] - cnt * (m_sc[...] + log_denom)) / cnt
        loss = neg_t_over_bt * mean_log_prob_pos                      # [TB, 1]
        # Lane-dense store: broadcast across 128 lanes -> unmasked vst.
        out_ref[...] = jnp.broadcast_to(loss, out_ref.shape).astype(out_ref.dtype)


def _masked_working_set(tb, tn, dp, feat_bytes, mask_bytes):
    streams = 2 * tn * dp * feat_bytes + 2 * tb * tn * mask_bytes
    resident = 3 * tb * dp * feat_bytes          # anchors (double-buf) + q scratch
    small = 6 * tb * 128 * 4                     # (TB,1) scratches / cnt / out
    temps = 6 * tb * tn * 4                      # [TB,TN] f32 temporaries (spill)
    return streams + resident + small + temps


def supcon_loss_masked(features, batch_size, mask,
                       temperature=TEMPERATURE, base_temperature=BASE_TEMPERATURE,
                       tile_b=_TILE_B, tile_n=_TILE_N):
    N, D = features.shape
    B = batch_size
    feat_dtype = features.dtype
    feat_bytes = jnp.dtype(feat_dtype).itemsize
    mask_bytes = 2                                 # mask is streamed as bf16

    Dp = _round_up(max(D, 128), 128)               # full lanes on the MXU contraction
    budget = _vmem_budget_bytes()

    TB = min(tile_b, _round_up(B, 8))
    TN = min(tile_n, _round_up(N, 128))
    while TN > 128 and _masked_working_set(TB, TN, Dp, feat_bytes, mask_bytes) > budget:
        TN = max(128, _round_up(TN // 2, 128))
    while TB > 8 and _masked_working_set(TB, TN, Dp, feat_bytes, mask_bytes) > budget:
        TB = max(8, _round_up(TB // 2, 8))
    Bp = _round_up(B, TB)
    Np = _round_up(N, TN)

    # Anchors are a separate grid-resident input (no per-step in-kernel slice).
    anchors = _pad_2d(features[:B], Bp, Dp)              # [Bp, Dp] native dtype
    feats_p = _pad_2d(features, Np, Dp)                  # [Np, Dp] native dtype
    # PiCO masks are binary (0/1) -> exact in bf16; halves the mask HBM stream.
    mask_p = _pad_2d(mask.astype(jnp.bfloat16), Bp, Np)  # [Bp, Np]

    # Per-row positive count (mask.sum(1) minus the diagonal hit removed by
    # logits_mask), computed once in the wrapper.  Padded rows get 1 (not 0)
    # so they stay finite; they are sliced off before the mean.
    maskf = mask.astype(jnp.float32)
    cnt = maskf.sum(axis=1) - maskf[jnp.arange(B), jnp.arange(B)]
    cnt_p = jnp.pad(cnt.reshape(B, 1), ((0, Bp - B), (0, 0)), constant_values=1.0)

    kernel = functools.partial(
        _supcon_masked_kernel,
        inv_t=1.0 / temperature,
        neg_t_over_bt=-(temperature / base_temperature),
        n_valid=N, tile_b=TB, tile_n=TN)

    per_row = pl.pallas_call(
        kernel,
        out_shape=jax.ShapeDtypeStruct((Bp, 128), jnp.float32),
        grid=(Bp // TB, Np // TN),
        in_specs=[
            pl.BlockSpec((TB, Dp), lambda ib, jn: (ib, 0)),    # anchors (resident over N)
            pl.BlockSpec((TN, Dp), lambda ib, jn: (jn, 0)),    # features, streamed
            pl.BlockSpec((TB, TN), lambda ib, jn: (ib, jn)),   # mask tile (bf16)
            pl.BlockSpec((TB, 1), lambda ib, jn: (ib, 0)),     # positive counts
        ],
        out_specs=pl.BlockSpec((TB, 128), lambda ib, jn: (ib, 0)),
        scratch_shapes=[pltpu.VMEM((TB, Dp), feat_dtype),       # scaled anchors
                        pltpu.VMEM((TB, 1), jnp.float32),       # running max
                        pltpu.VMEM((TB, 1), jnp.float32),       # exp-sum
                        pltpu.VMEM((TB, 1), jnp.float32)],      # sum(mask*adc)
        compiler_params=pltpu.CompilerParams(
            dimension_semantics=("parallel", "arbitrary"),
            vmem_limit_bytes=budget),
    )(anchors, feats_p, mask_p, cnt_p)

    # Tiny B-length mean stays in the wrapper (padded rows are sliced away).
    return jnp.mean(per_row[:B, 0])


# ----------------------------------------------------------------------------
# Branch 2: mask is None  (MoCo InfoNCE, positives at column 0)
# ----------------------------------------------------------------------------
def _supcon_infonce_kernel(q_ref, lpos_ref, queue_ref, out_ref,
                           q_sc, m_sc, s_sc, *, inv_t, k_valid, tile_k):
    """Streaming log-sum-exp over queue tiles; l_pos (wrapper-computed) seeds it."""
    jk = pl.program_id(1)

    @pl.when(jk == 0)
    def _init():
        q = q_ref[...]
        q_sc[...] = (q.astype(jnp.float32) * inv_t).astype(q_sc.dtype)  # 1/T folded once
        l_pos = lpos_ref[...]                                            # [TB, 1]
        m_sc[...] = l_pos                  # positive seeds the running max
        s_sc[...] = jnp.ones_like(l_pos)   # exp(l_pos - l_pos)

    l_neg = lax.dot_general(q_sc[...], queue_ref[...], (((1,), (1,)), ((), ())),
                            preferred_element_type=jnp.float32)          # [TB, TK]
    col = jk * tile_k + lax.broadcasted_iota(jnp.int32, l_neg.shape, 1)
    masked = jnp.where(col < k_valid, l_neg, -jnp.inf)    # drop queue padding

    m_prev = m_sc[...]
    m_new = jnp.maximum(m_prev, jnp.max(masked, axis=1, keepdims=True))
    p = jnp.exp(masked - m_new)
    s_sc[...] = jnp.exp(m_prev - m_new) * s_sc[...] + jnp.sum(p, axis=1, keepdims=True)
    m_sc[...] = m_new

    @pl.when(jk == pl.num_programs(1) - 1)
    def _finalize():
        lse = m_sc[...] + jnp.log(s_sc[...])
        loss = lse - lpos_ref[...]                         # CE with label 0
        out_ref[...] = jnp.broadcast_to(loss, out_ref.shape).astype(out_ref.dtype)


def _infonce_working_set(tb, tk, dp, feat_bytes):
    streams = 2 * tk * dp * feat_bytes
    resident = 3 * tb * dp * feat_bytes
    small = 5 * tb * 128 * 4
    temps = 4 * tb * tk * 4
    return streams + resident + small + temps


def supcon_loss_infonce(features, batch_size, temperature=TEMPERATURE,
                        tile_b=_TILE_B, tile_k=_TILE_N):
    N, D = features.shape
    B = batch_size
    K = N - 2 * B
    if K < 1:
        raise ValueError("InfoNCE branch needs a non-empty queue (N > 2*batch_size).")
    feat_dtype = features.dtype
    feat_bytes = jnp.dtype(feat_dtype).itemsize

    Dp = _round_up(max(D, 128), 128)
    budget = _vmem_budget_bytes()

    TB = min(tile_b, _round_up(B, 8))
    TK = min(tile_k, _round_up(K, 128))
    while TK > 128 and _infonce_working_set(TB, TK, Dp, feat_bytes) > budget:
        TK = max(128, _round_up(TK // 2, 128))
    while TB > 8 and _infonce_working_set(TB, TK, Dp, feat_bytes) > budget:
        TB = max(8, _round_up(TB // 2, 8))
    Bp = _round_up(B, TB)
    Kp = _round_up(K, TK)

    qf = features[:B]
    kf = features[B:2 * B]
    queue = features[2 * B:]

    # l_pos / T is a trivial [B] row-dot: do it in the wrapper (f32, matching
    # torch) and drop the momentum-key operand from the kernel entirely.
    l_pos = jnp.sum(qf.astype(jnp.float32) * kf.astype(jnp.float32),
                    axis=1, keepdims=True) * (1.0 / temperature)
    l_pos_p = jnp.pad(l_pos, ((0, Bp - B), (0, 0)))

    q_p = _pad_2d(qf, Bp, Dp)                          # [Bp, Dp]
    queue_p = _pad_2d(queue, Kp, Dp)                   # [Kp, Dp]

    kernel = functools.partial(_supcon_infonce_kernel,
                               inv_t=1.0 / temperature, k_valid=K, tile_k=TK)

    per_row = pl.pallas_call(
        kernel,
        out_shape=jax.ShapeDtypeStruct((Bp, 128), jnp.float32),
        grid=(Bp // TB, Kp // TK),
        in_specs=[
            pl.BlockSpec((TB, Dp), lambda ib, jk: (ib, 0)),   # q (resident over queue)
            pl.BlockSpec((TB, 1), lambda ib, jk: (ib, 0)),    # l_pos / T (resident)
            pl.BlockSpec((TK, Dp), lambda ib, jk: (jk, 0)),   # queue, streamed
        ],
        out_specs=pl.BlockSpec((TB, 128), lambda ib, jk: (ib, 0)),
        scratch_shapes=[pltpu.VMEM((TB, Dp), feat_dtype),     # scaled q
                        pltpu.VMEM((TB, 1), jnp.float32),     # running max
                        pltpu.VMEM((TB, 1), jnp.float32)],    # exp-sum
        compiler_params=pltpu.CompilerParams(
            dimension_semantics=("parallel", "arbitrary"),
            vmem_limit_bytes=budget),
    )(q_p, l_pos_p, queue_p)

    return jnp.mean(per_row[:B, 0])


def supcon_loss(features, batch_size, mask=None,
                temperature=TEMPERATURE, base_temperature=BASE_TEMPERATURE):
    """Forward pass of SupConLoss (PiCO 2022)."""
    if mask is not None:
        return supcon_loss_masked(features, batch_size, mask,
                                  temperature=temperature,
                                  base_temperature=base_temperature)
    return supcon_loss_infonce(features, batch_size, temperature=temperature)


# ----------------------------------------------------------------------------
# Pure-JAX references (semantics of the PyTorch module).  1/T is folded into
# the anchors — algebraically identical to torch.div(matmul(...), T).
# ----------------------------------------------------------------------------
def _ref_masked(features, batch_size, mask, t=TEMPERATURE, bt=BASE_TEMPERATURE):
    f = features.astype(jnp.float32)
    mask = mask.astype(jnp.float32)
    B = batch_size
    adc = (f[:B] * (1.0 / t)) @ f.T
    logits = adc - jnp.max(adc, axis=1, keepdims=True)
    N = f.shape[0]
    row = jnp.arange(B)[:, None]
    col = jnp.arange(N)[None, :]
    logits_mask = jnp.where(row == col, 0.0, 1.0)
    mask = mask * logits_mask
    exp_logits = jnp.exp(logits) * logits_mask
    log_prob = logits - jnp.log(exp_logits.sum(1, keepdims=True) + 1e-12)
    mean_log_prob_pos = (mask * log_prob).sum(1) / mask.sum(1)
    return (-(t / bt) * mean_log_prob_pos).mean()


def _ref_infonce(features, batch_size, t=TEMPERATURE):
    f = features.astype(jnp.float32)
    B = batch_size
    q = f[:B] * (1.0 / t)
    k, queue = f[B:2 * B], f[2 * B:]
    l_pos = jnp.sum(q * k, axis=1, keepdims=True)
    l_neg = q @ queue.T
    logits = jnp.concatenate([l_pos, l_neg], axis=1)
    lse = jax.nn.logsumexp(logits, axis=1)
    return jnp.mean(lse - logits[:, 0])


if __name__ == "__main__":
    key = jax.random.PRNGKey(0)
    batch_size = 8
    queue_size = 16
    D = 32
    N = 2 * batch_size + queue_size          # anchors + momentum keys + queue

    kf, km = jax.random.split(key)
    feats = jax.random.normal(kf, (N, D), dtype=jnp.float32)
    feats = feats / jnp.linalg.norm(feats, axis=1, keepdims=True)

    # Synthetic 0/1 positive mask [B, N]; guarantee >=1 off-diagonal positive
    # per row (each anchor's momentum key), like PiCO's pseudo-label mask.
    mask = (jax.random.uniform(km, (batch_size, N)) > 0.5).astype(jnp.float32)
    key_blk = jnp.maximum(mask[:, batch_size:2 * batch_size],
                          jnp.eye(batch_size, dtype=jnp.float32))
    mask = mask.at[:, batch_size:2 * batch_size].set(key_blk)

    # --- float32 path: tight check against the straight-line JAX reference ---
    loss_m = jax.block_until_ready(supcon_loss(feats, batch_size, mask))
    loss_i = jax.block_until_ready(supcon_loss(feats, batch_size, None))
    ref_m = _ref_masked(feats, batch_size, mask)
    ref_i = _ref_infonce(feats, batch_size)
    assert jnp.allclose(loss_m, ref_m, atol=1e-4, rtol=1e-4), (loss_m, ref_m)
    assert jnp.allclose(loss_i, ref_i, atol=1e-4, rtol=1e-4), (loss_i, ref_i)

    # --- bf16 storage path (half the DMA bytes, bf16 MXU rate; loose check) ---
    feats_bf16 = feats.astype(jnp.bfloat16)
    mask_bf16 = mask.astype(jnp.bfloat16)
    loss_mb = jax.block_until_ready(supcon_loss(feats_bf16, batch_size, mask_bf16))
    loss_ib = jax.block_until_ready(supcon_loss(feats_bf16, batch_size, None))
    ref_mb = _ref_masked(feats_bf16, batch_size, mask_bf16)
    ref_ib = _ref_infonce(feats_bf16, batch_size)
    assert jnp.allclose(loss_mb, ref_mb, atol=5e-2, rtol=5e-2), (loss_mb, ref_mb)
    assert jnp.allclose(loss_ib, ref_ib, atol=5e-2, rtol=5e-2), (loss_ib, ref_ib)

    print("KERNEL_OK")
</pallas_src>

<mosaic_0001>
module attributes {stable_mosaic.version = 11 : i64} {
  func.func @_supcon_masked_kernel(%arg0: i32, %arg1: i32, %arg2: memref<8x128xf32, #tpu.memory_space<vmem>>, %arg3: memref<128x128xf32, #tpu.memory_space<vmem>>, %arg4: memref<8x128xbf16, #tpu.memory_space<vmem>>, %arg5: memref<8x1xf32, #tpu.memory_space<vmem>>, %arg6: memref<8x128xf32, #tpu.memory_space<vmem>>, %arg7: memref<8x128xf32, #tpu.memory_space<vmem>>, %arg8: memref<8x1xf32, #tpu.memory_space<vmem>>, %arg9: memref<8x1xf32, #tpu.memory_space<vmem>>, %arg10: memref<8x1xf32, #tpu.memory_space<vmem>>) attributes {dimension_semantics = [#tpu.dimension_semantics<parallel>, #tpu.dimension_semantics<arbitrary>], iteration_bounds = array<i64: 1, 1>, scalar_prefetch = 0 : i64, scratch_operands = 4 : i64, tpu.core_type = #tpu.core_type<tc>, window_params = [{transform_indices = @transform_0, window_bounds = array<i64: 8, 128>}, {transform_indices = @transform_1, window_bounds = array<i64: 128, 128>}, {transform_indices = @transform_2, window_bounds = array<i64: 8, 128>}, {transform_indices = @transform_3, window_bounds = array<i64: 8, 1>}, {transform_indices = @transform_4, window_bounds = array<i64: 8, 128>}]} {
    %c0_i32 = arith.constant 0 : i32
    %0 = arith.cmpi eq, %arg1, %c0_i32 : i32
    %1 = arith.extui %0 : i1 to i32
    %c0_i32_0 = arith.constant 0 : i32
    %2 = arith.cmpi ne, %1, %c0_i32_0 : i32
    scf.if %2 {
      %c0_25 = arith.constant 0 : index
      %c0_26 = arith.constant 0 : index
      %49 = vector.load %arg2[%c0_25, %c0_26] : memref<8x128xf32, #tpu.memory_space<vmem>>, vector<8x128xf32>
      %cst_27 = arith.constant 14.2857141 : f32
      %50 = vector.broadcast %cst_27 : f32 to vector<8x128xf32>
      %51 = arith.mulf %49, %50 : vector<8x128xf32>
      %c0_28 = arith.constant 0 : index
      %c0_29 = arith.constant 0 : index
      %52 = vector.load %arg7[%c0_28, %c0_29] : memref<8x128xf32, #tpu.memory_space<vmem>>, vector<8x128xf32>
      tpu.vector_store %arg7[%c0_28, %c0_29], %51 {strides = array<i32>} : memref<8x128xf32, #tpu.memory_space<vmem>>, vector<8x128xf32>,
      %cst_30 = arith.constant 0xFF800000 : f32
      %53 = vector.broadcast %cst_30 : f32 to vector<8x1xf32>
      %c0_31 = arith.constant 0 : index
      %c0_32 = arith.constant 0 : index
      %54 = vector.load %arg8[%c0_31, %c0_32] : memref<8x1xf32, #tpu.memory_space<vmem>>, vector<8x1xf32>
      tpu.vector_store %arg8[%c0_31, %c0_32], %53 {strides = array<i32>} : memref<8x1xf32, #tpu.memory_space<vmem>>, vector<8x1xf32>,
      %cst_33 = arith.constant 0.000000e+00 : f32
      %55 = vector.broadcast %cst_33 : f32 to vector<8x1xf32>
      %c0_34 = arith.constant 0 : index
      %c0_35 = arith.constant 0 : index
      %56 = vector.load %arg9[%c0_34, %c0_35] : memref<8x1xf32, #tpu.memory_space<vmem>>, vector<8x1xf32>
      tpu.vector_store %arg9[%c0_34, %c0_35], %55 {strides = array<i32>} : memref<8x1xf32, #tpu.memory_space<vmem>>, vector<8x1xf32>,
      %cst_36 = arith.constant 0.000000e+00 : f32
      %57 = vector.broadcast %cst_36 : f32 to vector<8x1xf32>
      %c0_37 = arith.constant 0 : index
      %c0_38 = arith.constant 0 : index
      %58 = vector.load %arg10[%c0_37, %c0_38] : memref<8x1xf32, #tpu.memory_space<vmem>>, vector<8x1xf32>
      tpu.vector_store %arg10[%c0_37, %c0_38], %57 {strides = array<i32>} : memref<8x1xf32, #tpu.memory_space<vmem>>, vector<8x1xf32>,
    } else {
    }
    %c0 = arith.constant 0 : index
    %c0_1 = arith.constant 0 : index
    %3 = vector.load %arg7[%c0, %c0_1] : memref<8x128xf32, #tpu.memory_space<vmem>>, vector<8x128xf32>
    %c0_2 = arith.constant 0 : index
    %c0_3 = arith.constant 0 : index
    %4 = vector.load %arg3[%c0_2, %c0_3] : memref<128x128xf32, #tpu.memory_space<vmem>>, vector<128x128xf32>
    %cst = arith.constant dense<0.000000e+00> : vector<8x128xf32>
    %5 = tpu.matmul %3, %4, %cst {dimension_numbers = #tpu.dot_dimension_numbers<[1], [1], [0], [0], [0, 0, 1, 0], [], []>} : vector<8x128xf32>, vector<128x128xf32>, vector<8x128xf32> -> vector<8x128xf32>
    %c8_i32 = arith.constant 8 : i32
    %6 = arith.muli %arg0, %c8_i32 : i32
    %7 = tpu.iota {dimensions = array<i32: 0>} : vector<8x128xi32>
    %8 = vector.broadcast %6 : i32 to vector<8x128xi32>
    %9 = arith.addi %8, %7 : vector<8x128xi32>
    %c128_i32 = arith.constant 128 : i32
    %10 = arith.muli %arg1, %c128_i32 : i32
    %11 = tpu.iota {dimensions = array<i32: 1>} : vector<8x128xi32>
    %12 = vector.broadcast %10 : i32 to vector<8x128xi32>
    %13 = arith.addi %12, %11 : vector<8x128xi32>
    %14 = arith.cmpi ne, %9, %13 : vector<8x128xi32>
    %c32_i32 = arith.constant 32 : i32
    %15 = vector.broadcast %c32_i32 : i32 to vector<8x128xi32>
    %16 = arith.cmpi slt, %13, %15 : vector<8x128xi32>
    %17 = arith.andi %16, %14 : vector<8x128xi1>
    %cst_4 = arith.constant 0xFF800000 : f32
    %18 = vector.broadcast %cst_4 : f32 to vector<8x128xf32>
    %19 = arith.select %17, %5, %18 : vector<8x128xi1>, vector<8x128xf32>
    %c0_5 = arith.constant 0 : index
    %c0_6 = arith.constant 0 : index
    %20 = vector.load %arg8[%c0_5, %c0_6] : memref<8x1xf32, #tpu.memory_space<vmem>>, vector<8x1xf32>
    %cst_7 = arith.constant dense<0xFF800000> : vector<8xf32>
    %21 = vector.multi_reduction <maximumf>, %19, %cst_7 [1] : vector<8x128xf32> to vector<8xf32>
    %22 = vector.shape_cast %21 : vector<8xf32> to vector<8x1xf32>
    %23 = arith.maximumf %20, %22 : vector<8x1xf32>
    %24 = vector.broadcast %23 : vector<8x1xf32> to vector<8x128xf32>
    %25 = arith.subf %19, %24 : vector<8x128xf32>
    %26 = math.exp %25 : vector<8x128xf32>
    %27 = arith.subf %20, %23 : vector<8x1xf32>
    %28 = math.exp %27 : vector<8x1xf32>
    %c0_8 = arith.constant 0 : index
    %c0_9 = arith.constant 0 : index
    %29 = vector.load %arg9[%c0_8, %c0_9] : memref<8x1xf32, #tpu.memory_space<vmem>>, vector<8x1xf32>
    %30 = arith.mulf %28, %29 : vector<8x1xf32>
    %cst_10 = arith.constant dense<0.000000e+00> : vector<8xf32>
    %31 = vector.multi_reduction <add>, %26, %cst_10 [1] : vector<8x128xf32> to vector<8xf32>
    %32 = vector.shape_cast %31 : vector<8xf32> to vector<8x1xf32>
    %33 = arith.addf %30, %32 : vector<8x1xf32>
    %c0_11 = arith.constant 0 : index
    %c0_12 = arith.constant 0 : index
    %34 = vector.load %arg9[%c0_11, %c0_12] : memref<8x1xf32, #tpu.memory_space<vmem>>, vector<8x1xf32>
    tpu.vector_store %arg9[%c0_11, %c0_12], %33 {strides = array<i32>} : memref<8x1xf32, #tpu.memory_space<vmem>>, vector<8x1xf32>,
    %c0_13 = arith.constant 0 : index
    %c0_14 = arith.constant 0 : index
    %35 = vector.load %arg4[%c0_13, %c0_14] : memref<8x128xbf16, #tpu.memory_space<vmem>>, vector<8x128xbf16>
    %36 = arith.extf %35 : vector<8x128xbf16> to vector<8x128xf32>
    %cst_15 = arith.constant 0.000000e+00 : f32
    %37 = vector.broadcast %cst_15 : f32 to vector<8x128xf32>
    %38 = arith.select %14, %36, %37 : vector<8x128xi1>, vector<8x128xf32>
    %c0_16 = arith.constant 0 : index
    %c0_17 = arith.constant 0 : index
    %39 = vector.load %arg10[%c0_16, %c0_17] : memref<8x1xf32, #tpu.memory_space<vmem>>, vector<8x1xf32>
    %40 = arith.mulf %38, %5 : vector<8x128xf32>
    %cst_18 = arith.constant dense<0.000000e+00> : vector<8xf32>
    %41 = vector.multi_reduction <add>, %40, %cst_18 [1] : vector<8x128xf32> to vector<8xf32>
    %42 = vector.shape_cast %41 : vector<8xf32> to vector<8x1xf32>
    %43 = arith.addf %39, %42 : vector<8x1xf32>
    %c0_19 = arith.constant 0 : index
    %c0_20 = arith.constant 0 : index
    %44 = vector.load %arg10[%c0_19, %c0_20] : memref<8x1xf32, #tpu.memory_space<vmem>>, vector<8x1xf32>
    tpu.vector_store %arg10[%c0_19, %c0_20], %43 {strides = array<i32>} : memref<8x1xf32, #tpu.memory_space<vmem>>, vector<8x1xf32>,
    %c0_21 = arith.constant 0 : index
    %c0_22 = arith.constant 0 : index
    %45 = vector.load %arg8[%c0_21, %c0_22] : memref<8x1xf32, #tpu.memory_space<vmem>>, vector<8x1xf32>
    tpu.vector_store %arg8[%c0_21, %c0_22], %23 {strides = array<i32>} : memref<8x1xf32, #tpu.memory_space<vmem>>, vector<8x1xf32>,
    %c0_i32_23 = arith.constant 0 : i32
    %46 = arith.cmpi eq, %arg1, %c0_i32_23 : i32
    %47 = arith.extui %46 : i1 to i32
    %c0_i32_24 = arith.constant 0 : i32
    %48 = arith.cmpi ne, %47, %c0_i32_24 : i32
    scf.if %48 {
      %c0_25 = arith.constant 0 : index
      %c0_26 = arith.constant 0 : index
      %49 = vector.load %arg5[%c0_25, %c0_26] : memref<8x1xf32, #tpu.memory_space<vmem>>, vector<8x1xf32>
      %c0_27 = arith.constant 0 : index
      %c0_28 = arith.constant 0 : index
      %50 = vector.load %arg9[%c0_27, %c0_28] : memref<8x1xf32, #tpu.memory_space<vmem>>, vector<8x1xf32>
      %cst_29 = arith.constant 9.99999996E-13 : f32
      %51 = vector.broadcast %cst_29 : f32 to vector<8x1xf32>
      %52 = arith.addf %50, %51 : vector<8x1xf32>
      %53 = math.log %52 : vector<8x1xf32>
      %c0_30 = arith.constant 0 : index
      %c0_31 = arith.constant 0 : index
      %54 = vector.load %arg10[%c0_30, %c0_31] : memref<8x1xf32, #tpu.memory_space<vmem>>, vector<8x1xf32>
      %c0_32 = arith.constant 0 : index
      %c0_33 = arith.constant 0 : index
      %55 = vector.load %arg8[%c0_32, %c0_33] : memref<8x1xf32, #tpu.memory_space<vmem>>, vector<8x1xf32>
      %56 = arith.addf %55, %53 : vector<8x1xf32>
      %57 = arith.mulf %49, %56 : vector<8x1xf32>
      %58 = arith.subf %54, %57 : vector<8x1xf32>
      %59 = arith.divf %58, %49 : vector<8x1xf32>
      %cst_34 = arith.constant -1.000000e+00 : f32
      %60 = vector.broadcast %cst_34 : f32 to vector<8x1xf32>
      %61 = arith.mulf %60, %59 : vector<8x1xf32>
      %62 = vector.shape_cast %61 : vector<8x1xf32> to vector<8x1xf32>
      %63 = vector.broadcast %62 : vector<8x1xf32> to vector<8x128xf32>
      %c0_35 = arith.constant 0 : index
      %c0_36 = arith.constant 0 : index
      %64 = vector.load %arg6[%c0_35, %c0_36] : memref<8x128xf32, #tpu.memory_space<vmem>>, vector<8x128xf32>
      tpu.vector_store %arg6[%c0_35, %c0_36], %63 {strides = array<i32>} : memref<8x128xf32, #tpu.memory_space<vmem>>, vector<8x128xf32>,
    } else {
    }
    return
  }
  func.func @transform_0(%arg0: i32, %arg1: i32) -> (i32, i32) {
    %c0_i32 = arith.constant 0 : i32
    %c0_i32_0 = arith.constant 0 : i32
    return %arg0, %c0_i32 : i32, i32
  }
  func.func @transform_1(%arg0: i32, %arg1: i32) -> (i32, i32) {
    %c0_i32 = arith.constant 0 : i32
    %c0_i32_0 = arith.constant 0 : i32
    return %arg1, %c0_i32 : i32, i32
  }
  func.func @transform_2(%arg0: i32, %arg1: i32) -> (i32, i32) {
    %c0_i32 = arith.constant 0 : i32
    return %arg0, %arg1 : i32, i32
  }
  func.func @transform_3(%arg0: i32, %arg1: i32) -> (i32, i32) {
    %c0_i32 = arith.constant 0 : i32
    %c0_i32_0 = arith.constant 0 : i32
    return %arg0, %c0_i32 : i32, i32
  }
  func.func @transform_4(%arg0: i32, %arg1: i32) -> (i32, i32) {
    %c0_i32 = arith.constant 0 : i32
    %c0_i32_0 = arith.constant 0 : i32
    return %arg0, %c0_i32 : i32, i32
  }
}

</mosaic_0001>

<bundles_post_ra>
// kernel: tpu_custom_call.1
= control target key start
LH: loop header
LB: loop body
LE: loop exit
PB: predicated region body
PF: predicated region fallthrough
CT: control target
= control target key end

     0   :  { %9 = vsyncpa [#allocation7], 0  ;;  %s345_s0 = inlined_call_operand.vmem [shape: f32[8,128], index: 0, kind: input, shape index: {}]   ;;  %s346_s1 = inlined_call_operand.hbm [shape: f32[128,128], index: 1, kind: input, shape index: {}]   ;;  %s347_s2 = inlined_call_operand.hbm [shape: bf16[8,128], index: 2, kind: input, shape index: {}]   ;;  %s348_s3 = inlined_call_operand.vmem [shape: f32[8,1], index: 3, kind: input, shape index: {}]   ;;  %s349_s4 = inlined_call_operand.hbm [shape: f32[8,128], index: 4, kind: output, shape index: {}]  }
   0x1   :  { %10 = vsyncpa [#allocation10], 0 }
   0x2   :  { %11 = vsyncpa [#allocation8], 0  ;;  %s18_s17 = sshll.u32 %s346_s1, 4  ;;  %s291_s18 = smov [#allocation6]   ;;  %s19_s17 = int_to_ptr.hbm [resolvable:$true] %s18_s17 }
   0x3   :  { %s20_s19 = sshll.u32 %s291_s18, 4  ;;  %s32_s22 = sshll.u32 %s347_s2, 4  ;;  %s21_s19 = int_to_ptr.vmem [resolvable:$true] %s20_s19  ;;  %s33_s22 = int_to_ptr.hbm [resolvable:$true] %s32_s22 }
   0x4   :  { %s292_s23 = smov 128   ;;  %s293_s24 = smov 8  }
   0x5   :  { %26 = dma.hbm_to_vmem [thread:$0]  %s19_s17, 2048, %s21_s19, [#allocation7], %s292_s23, %s292_s23, %s293_s24  }
   0x6   :  { %s294_s25 = smov [#allocation9]  }
   0x7   :  { %s34_s26 = sshll.u32 %s294_s25, 4  ;;  %s35_s26 = int_to_ptr.vmem [resolvable:$true] %s34_s26 }
   0x8   :  { %37 = dma.hbm_to_vmem [thread:$0]  %s33_s22, 64, %s35_s26, [#allocation10]  }
   0x9   :  { %285 = dma.done.wait [#allocation7], 2048  }
   0xa   :  { %286 = vsyncadd [#allocation7], 4294965248 }
   0xb   :  { %287 = dma.done.wait [#allocation10], 64  }
   0xc   :  { %288 = vsyncadd [#allocation10], 4294967232  ;;  %v75_v0 = vld [vmem:[#allocation6 + $0x78] sm:$0xff]  ;;  %v74_v1 = vld [vmem:[#allocation6 + $0x70] sm:$0xff]  ;;  %vm55_vm0 = vcmask 7168   ;;  %v295_v18 = vmov -inf   ;;  %v97_v19 = vlaneseq }
   0xd   :  { %76 = vmatpush.xpose.msra.mxu0 %v75_v0  ;;  %v73_v2 = vld [vmem:[#allocation6 + $0x68] sm:$0xff]  ;;  %v72_v3 = vld [vmem:[#allocation6 + $0x60] sm:$0xff]  ;;  %v71_v4 = vld [vmem:[#allocation6 + $0x58] sm:$0xff]  ;;  %56 = vst.msk [vmem:[#allocation3] sm:$0xff] %vm55_vm0, %v295_v18  ;;  %v296_v28 = vmov 0   ;;  %v297_v29 = vmov 0.0  }
   0xe   :  { %v70_v5 = vld [vmem:[#allocation6 + $0x50] sm:$0xff]  ;;  %v69_v6 = vld [vmem:[#allocation6 + $0x48] sm:$0xff]  ;;  %v68_v7 = vld [vmem:[#allocation6 + $0x40] sm:$0xff]  ;;  %v98_v20 = vshrl.u32 %v97_v19, 7  ;;  %v103_v21 = vand.u32 127, %v97_v19  ;;  %203 = vset.pattern.permute.xlu0 %v296_v28  ;;  %204 = vset.pattern.permute.xlu2 %v296_v28  ;;  %57 = vst.msk [vmem:[#allocation4] sm:$0xff] %vm55_vm0, %v297_v29 }
   0xf   :  { %v67_v8 = vld [vmem:[#allocation6 + $0x38] sm:$0xff]  ;;  %v66_v9 = vld [vmem:[#allocation6 + $0x30] sm:$0xff]  ;;  %v65_v10 = vld [vmem:[#allocation6 + $0x28] sm:$0xff]  ;;  %58 = vst.msk [vmem:[#allocation5] sm:$0xff] %vm55_vm0, %v297_v29  ;;  %s184_s5 = sshll.u32 %s349_s4, 4  ;;  %s185_s5 = int_to_ptr.hbm [resolvable:$true] %s184_s5 }
  0x10   :  { %v64_v11 = vld [vmem:[#allocation6 + $0x20] sm:$0xff]  ;;  %v63_v12 = vld [vmem:[#allocation6 + $0x18] sm:$0xff]  ;;  %v62_v13 = vld [vmem:[#allocation6 + $0x10] sm:$0xff]  ;;  %vm106_vm1 = vcmp.ne.s32.totalorder %v98_v20, %v103_v21  ;;  %vm107_vm2 = vcmp.lt.s32.totalorder %v103_v21, 32 }
  0x11   :  { %77 = vmatpush.xpose.msra.mxu0 %v74_v1  ;;  %v61_v14 = vld [vmem:[#allocation6 + $0x8] sm:$0xff]  ;;  %v60_v16 = vld [vmem:[#allocation6] sm:$0xff]  ;;  %vm108_vm3 = vmand %vm107_vm2, %vm106_vm1 }
  0x12   :  { %v52_v15 = vld [vmem:[%s345_s0] sm:$0xff]  ;;  %v132_v22 = vld [vmem:[#allocation9] sm:$0xf] }
  0x13   :  { %v53_v17 = vmul.f32 14.285714, %v52_v15  ;;  %v133_v23 = vunpack.c.l.bf16 %v132_v22  ;;  %v145_v39 = vld [vmem:[%s348_s3] sm:$0xff]  ;;  %s298_s3 = smov [#allocation11]  }
  0x14   :  { %v110_v30 = vld [vmem:[#allocation3] sm:$0xff]  ;;  %vm160_vm4 = vweird.f32 %v145_v39  ;;  %v166_v54 = vand.u32 2147483648, %v145_v39  ;;  %v164_v56 = vand.u32 2147483647, %v145_v39  ;;  %s182_s28 = sshll.u32 %s298_s3, 4  ;;  %s183_s28 = int_to_ptr.vmem [resolvable:$true] %s182_s28 }
  0x15   :  { %78 = vmatpush.xpose.msra.mxu0 %v73_v2  ;;  %v134_v24 = vsel %vm106_vm1, %v133_v23, 0.0  ;;  %v125_v41 = vld [vmem:[#allocation4] sm:$0xff] }
  0x16   :  { %v135_v46 = vld [vmem:[#allocation5] sm:$0xff]  ;;  %v167_v60 = vor.u32 1.1754944e-38, %v166_v54  ;;  %vm165_vm7 = vcmp.eq.f32.partialorder %v164_v56, 8.507059e+37 }
  0x19   :  { %79 = vmatpush.xpose.msra.mxu0 %v72_v3 }
  0x1d   :  { %80 = vmatpush.xpose.msra.mxu0 %v71_v4 }
  0x21   :  { %81 = vmatpush.xpose.msra.mxu0 %v70_v5 }
  0x25   :  { %82 = vmatpush.xpose.msra.mxu0 %v69_v6 }
  0x29   :  { %83 = vmatpush.xpose.msra.mxu0 %v68_v7 }
  0x2d   :  { %84 = vmatpush.xpose.msra.mxu0 %v67_v8 }
  0x31   :  { %85 = vmatpush.xpose.msra.mxu0 %v66_v9 }
  0x35   :  { %86 = vmatpush.xpose.msra.mxu0 %v65_v10 }
  0x39   :  { %87 = vmatpush.xpose.msra.mxu0 %v64_v11 }
  0x3d   :  { %88 = vmatpush.xpose.msra.mxu0 %v63_v12 }
  0x41   :  { %89 = vmatpush.xpose.msra.mxu0 %v62_v13 }
  0x45   :  { %90 = vmatpush.xpose.msra.mxu0 %v61_v14 }
  0x49   :  { %91 = vmatpush.xpose.msra.mxu0 %v60_v16 }
  0x4c   :  { %92 = vmatmul.f32.vlgmr.msra.gmra.mxu0 %v53_v17 }
  0xc9   :  { %v93_v25 = vpop.f32.mrf.mxu0 }
  0xca   :  { %v136_v26 = vmul.f32 %v134_v24, %v93_v25  ;;  %v109_v27 = vsel %vm108_vm3, %v93_v25, -inf }
  0xcb   :  { %111 = vmax.xlane.f32.xlu0 %v109_v27 }
 0x13e   :  { %v112_v31 = vpop.xlane.xlu0 %111 }
 0x13f   :  { %v113_v32 = vmax.f32 %v110_v30, %v112_v31 }
 0x141   :  { %v122_v33 = vsub.f32 %v110_v30, %v113_v32  ;;  %141 = vst.msk [vmem:[#allocation3] sm:$0xff] %vm55_vm0, %v113_v32  ;;  %116 = vperm.xlu0 %203, %v113_v32  }
 0x143   :  { %v123_v38 = vmul.f32 1.442695, %v122_v33 }
 0x148   :  { %v151_v59 = vld [vmem:[#allocation3] sm:$0xff] }
 0x1b3   :  { %v117_v34 = vpop.permute.xlu0 %116 }
 0x1b4   :  { %v119_v35 = vsub.f32 %v109_v27, %v117_v34 }
 0x1b6   :  { %v120_v36 = vmul.f32 1.442695, %v119_v35 }
 0x1b8   :  { %205 = vpow2.f32 %v120_v36 }
 0x1b9   :  { %207 = vpow2.f32 %v123_v38 }
 0x1ba   :  { %209 = vrcp.f32 %v145_v39 }
 0x1be   :  { %v206_v37 = vpop.eup %205 }
 0x1bf   :  { %127 = vadd.xlane.f32.xlu1 %v206_v37  ;;  %v208_v40 = vpop.eup %207 }
 0x1c0   :  { %v126_v42 = vmul.f32 %v208_v40, %v125_v41  ;;  %v210_v45 = vpop.eup %209 }
 0x1c1   :  { %v156_v47 = vmul.f32 %v210_v45, %v145_v39  ;;  %vm161_vm5 = vweird.f32 %v210_v45 }
 0x1c2   :  { %vm162_vm6 = vmor %vm160_vm4, %vm161_vm5 }
 0x1c3   :  { %v157_v51 = vsub.f32 1.0, %v156_v47 }
 0x1c5   :  { %v158_v53 = vmul.f32 %v210_v45, %v157_v51 }
 0x1c7   :  { %137 = vadd.xlane.f32.xlu1 %v136_v26  ;;  %v159_v55 = vadd.f32 %v210_v45, %v158_v53 }
 0x1c9   :  { %v163_v62 = vsel %vm162_vm6, %v210_v45, %v159_v55 }
 0x1ca   :  { %v168_v1 = vsel %vm165_vm7, %v167_v60, %v163_v62 }
 0x232   :  { %v128_v43 = vpop.xlane.xlu1 %127 }
 0x233   :  { %v129_v44 = vadd.f32 %v128_v43, %v126_v42 }
 0x235   :  { %131 = vst.msk [vmem:[#allocation4] sm:$0xff] %vm55_vm0, %v129_v44 }
 0x23a   :  { %v138_v48 = vpop.xlane.xlu1 %137 }
 0x23b   :  { %v139_v49 = vadd.f32 %v138_v48, %v135_v46 }
 0x23c   :  { %v146_v50 = vld [vmem:[#allocation4] sm:$0xff] }
 0x23d   :  { %140 = vst.msk [vmem:[#allocation5] sm:$0xff] %vm55_vm0, %v139_v49  ;;  %v147_v52 = vadd.f32 1e-12, %v146_v50 }
 0x23f   :  { %211 = vlog2.f32 %v147_v52 }
 0x244   :  { %v150_v0 = vld [vmem:[#allocation5] sm:$0xff] }
 0x245   :  { %v212_v57 = vpop.eup %211 }
 0x246   :  { %v149_v58 = vmul.f32 0.6931472, %v212_v57 }
 0x248   :  { %v152_v61 = vadd.f32 %v151_v59, %v149_v58 }
 0x24a   :  { %v153_v63 = vmul.f32 %v152_v61, %v145_v39 }
 0x24c   :  { %v154_v2 = vsub.f32 %v150_v0, %v153_v63 }
 0x24e   :  { %v169_v3 = vmul.f32 %v168_v1, %v154_v2 }
 0x250   :  { %v170_v4 = vmul.f32 -1.0, %v169_v3 }
 0x252   :  { %173 = vperm.xlu2 %204, %v170_v4  }
 0x2ac   :  { %v174_v5 = vpop.permute.xlu2 %173 }
 0x2ad   :  { %176 = vst [vmem:[#allocation11] sm:$0xff] %v174_v5 }
 0x2ae   :  { %187 = dma.vmem_to_hbm [thread:$0]  %s183_s28, 128, %s185_s5, [#allocation8]  }
 0x2af   :  { %289 = dma.done.wait [#allocation8], 128  }
 0x2b0   :  { %290 = vsyncadd [#allocation8], 4294967168 }
 0x2b1   :  { %192 = vsyncpa [#allocation7], 1 }
 0x2b2   :  { %193 = vsyncpa [#allocation10], 1 }
 0x2b3   :  { %194 = vsyncpa [#allocation8], 1 }

</bundles_post_ra>
